<compile_context>
chip_gen: v6e
topology: v6e:2x2x1
jax: 0.10.0
libtpu: 0.0.40
codegen_flags: <defaults>
</compile_context>

<pallas_src>
import functools

import jax
import jax.numpy as jnp
from jax.experimental import pallas as pl
from jax.experimental.pallas import tpu as pltpu


# ----------------------------------------------------------------------------
# kernel helpers
# ----------------------------------------------------------------------------
def _shifted_taps(a, L, Cin):
    """[a[l-1], a[l], a[l+1]] concatenated on the lane axis with zero boundaries
    (conv padding=1).  Built with XLU rolls + edge masks: no misaligned slices,
    no jnp.pad, no extra VMEM copies."""
    row = jax.lax.broadcasted_iota(jnp.int32, (L, Cin), 0)
    a_m1 = jnp.where(row == 0, 0.0, pltpu.roll(a, 1, axis=0))        # a[l-1]
    a_p1 = jnp.where(row == L - 1, 0.0, pltpu.roll(a, L - 1, axis=0))  # a[l+1]
    return jnp.concatenate([a_m1, a, a_p1], axis=1)                  # (L, 3*Cin)


def _partial_stats(y):
    """Per-sample sum and sum-of-squares (single sweep, f32 accumulation)."""
    return jnp.concatenate(
        [jnp.sum(y, axis=0, keepdims=True),
         jnp.sum(y * y, axis=0, keepdims=True)], axis=0)             # (2, C2)


# ----------------------------------------------------------------------------
# kernels (one grid step == one batch sample)
# ----------------------------------------------------------------------------
def _conv_stats_kernel(x_ref, w_ref, y_ref, stats_ref, *, L, Cin, mxu_dtype):
    """conv1 (im2col, single MXU matmul, bias dropped) + partial BN stats."""
    x = x_ref[...].astype(jnp.float32)                               # (L, Cin)
    taps = _shifted_taps(x, L, Cin).astype(mxu_dtype)                # (L, 3*Cin)
    y = jnp.dot(taps, w_ref[...].astype(mxu_dtype),
                preferred_element_type=jnp.float32)                  # (L, C2)
    y_ref[...] = y
    stats_ref[...] = _partial_stats(y)


def _bn_act_conv_stats_kernel(y_ref, scale_ref, shift_ref, w_ref,
                              z_ref, stats_ref, *, L, Cin, neg_slope, mxu_dtype):
    """fused BN (one FMA) -> LeakyReLU -> conv2 (im2col) + partial BN stats."""
    a = y_ref[...] * scale_ref[...] + shift_ref[...]                 # BN, f32
    a = jnp.where(a > 0, a, neg_slope * a)                           # LeakyReLU
    taps = _shifted_taps(a, L, Cin).astype(mxu_dtype)
    z = jnp.dot(taps, w_ref[...].astype(mxu_dtype),
                preferred_element_type=jnp.float32)
    z_ref[...] = z
    stats_ref[...] = _partial_stats(z)


def _bn_act_pool_kernel(z_ref, scale_ref, shift_ref, out_ref, *, L, C2, neg_slope):
    """fused BN -> LeakyReLU -> MaxPool1d(2,2) via adjacent-sublane max."""
    a = z_ref[...] * scale_ref[...] + shift_ref[...]
    a = jnp.where(a > 0, a, neg_slope * a)
    out_ref[...] = jnp.max(a.reshape(L // 2, 2, C2), axis=1).astype(out_ref.dtype)


# ----------------------------------------------------------------------------
# wrapper
# ----------------------------------------------------------------------------
def _bn_scale_shift(stats, gamma, beta, count, eps):
    """Fold per-sample (sum, sumsq) into per-channel BN scale/shift vectors."""
    s = jnp.sum(stats[:, 0, :], axis=0)
    sq = jnp.sum(stats[:, 1, :], axis=0)
    mean = s / count
    var = jnp.maximum(sq / count - mean * mean, 0.0)   # biased batch variance
    scale = gamma * jax.lax.rsqrt(var + eps)
    shift = beta - mean * scale
    return scale.reshape(1, -1), shift.reshape(1, -1)


def contracting_block(x_ncl, params, *, eps=1e-5, neg_slope=0.2,
                      mxu_dtype=jnp.bfloat16):
    """x_ncl: (N, C, L) float32 (PyTorch NCL). Returns (N, 2C, L//2)."""
    N, C, L = x_ncl.shape
    C2 = 2 * C
    assert L % 2 == 0

    # NCL -> NLC so channels map to TPU lanes (kept in the wrapper only because
    # the public interface is NCL; an NLC-native model would drop both transposes).
    x_nlc = jnp.transpose(x_ncl, (0, 2, 1))

    # conv weights (out, in, k) -> im2col layout (k*in, out): one matmul per conv.
    w1 = jnp.transpose(params["conv1_w"], (2, 1, 0)).reshape(3 * C, C2)
    w2 = jnp.transpose(params["conv2_w"], (2, 1, 0)).reshape(3 * C2, C2)
    # conv biases intentionally NOT passed: training-mode BN cancels them exactly.
    gamma = params["bn_gamma"]
    beta = params["bn_beta"]

    cparams = pltpu.CompilerParams(
        dimension_semantics=("parallel",),      # batch grid -> both TCs on v7x
        vmem_limit_bytes=32 * 1024 * 1024,      # explicit budget, safe on v5e/v6e/v7x
    )

    def batch_spec(l, c):                       # per-sample block, batch squeezed
        return pl.BlockSpec((None, l, c), lambda b: (b, 0, 0))

    def shared_spec(r, c):                      # same block every grid step
        return pl.BlockSpec((r, c), lambda b: (0, 0))

    count = float(N * L)

    # --- call A: conv1 + per-sample partial BN statistics --------------------
    y1, stats1 = pl.pallas_call(
        functools.partial(_conv_stats_kernel, L=L, Cin=C, mxu_dtype=mxu_dtype),
        grid=(N,),
        in_specs=[batch_spec(L, C), shared_spec(3 * C, C2)],
        out_specs=[batch_spec(L, C2), batch_spec(2, C2)],
        out_shape=[jax.ShapeDtypeStruct((N, L, C2), jnp.float32),
                   jax.ShapeDtypeStruct((N, 2, C2), jnp.float32)],
        compiler_params=cparams,
    )(x_nlc, w1)

    scale1, shift1 = _bn_scale_shift(stats1, gamma, beta, count, eps)

    # --- call B: BN(y1) -> LeakyReLU -> conv2 + partial BN statistics --------
    z, stats2 = pl.pallas_call(
        functools.partial(_bn_act_conv_stats_kernel, L=L, Cin=C2,
                          neg_slope=neg_slope, mxu_dtype=mxu_dtype),
        grid=(N,),
        in_specs=[batch_spec(L, C2), shared_spec(1, C2), shared_spec(1, C2),
                  shared_spec(3 * C2, C2)],
        out_specs=[batch_spec(L, C2), batch_spec(2, C2)],
        out_shape=[jax.ShapeDtypeStruct((N, L, C2), jnp.float32),
                   jax.ShapeDtypeStruct((N, 2, C2), jnp.float32)],
        compiler_params=cparams,
    )(y1, scale1, shift1, w2)

    scale2, shift2 = _bn_scale_shift(stats2, gamma, beta, count, eps)

    # --- call C: BN(z) -> LeakyReLU -> MaxPool1d(2,2) -------------------------
    out_nlc = pl.pallas_call(
        functools.partial(_bn_act_pool_kernel, L=L, C2=C2, neg_slope=neg_slope),
        grid=(N,),
        in_specs=[batch_spec(L, C2), shared_spec(1, C2), shared_spec(1, C2)],
        out_specs=batch_spec(L // 2, C2),
        out_shape=jax.ShapeDtypeStruct((N, L // 2, C2), x_ncl.dtype),
        compiler_params=cparams,
    )(z, scale2, shift2)

    # NLC -> NCL to match the PyTorch output convention
    return jnp.transpose(out_nlc, (0, 2, 1))


# ----------------------------------------------------------------------------
# parameters + pure-JAX reference
# ----------------------------------------------------------------------------
def init_params(key, input_channels):
    """Deterministic synthetic parameters with the module's shapes."""
    c, c2 = input_channels, 2 * input_channels
    k1, k2, k3, k4 = jax.random.split(key, 4)
    s1 = 1.0 / jnp.sqrt(jnp.float32(c * 3))
    s2 = 1.0 / jnp.sqrt(jnp.float32(c2 * 3))
    return {
        "conv1_w": jax.random.uniform(k1, (c2, c, 3), jnp.float32, -s1, s1),
        "conv1_b": jax.random.uniform(k2, (c2,), jnp.float32, -s1, s1),
        "conv2_w": jax.random.uniform(k3, (c2, c2, 3), jnp.float32, -s2, s2),
        "conv2_b": jax.random.uniform(k4, (c2,), jnp.float32, -s2, s2),
        "bn_gamma": jnp.ones((c2,), jnp.float32),
        "bn_beta": jnp.zeros((c2,), jnp.float32),
    }


def _reference(x_ncl, params, *, eps=1e-5, neg_slope=0.2, conv_dtype=jnp.float32):
    """Pure-JAX reference; conv_dtype lets us mirror the kernel's MXU dtype."""
    def conv1d(x, w, b):
        y = jax.lax.conv_general_dilated(
            x.astype(conv_dtype), w.astype(conv_dtype),
            window_strides=(1,), padding=((1, 1),),
            dimension_numbers=("NCH", "OIH", "NCH"),
            preferred_element_type=jnp.float32)
        return y + b[None, :, None]

    def bn(x, g, bt):
        mean = jnp.mean(x, axis=(0, 2), keepdims=True)
        var = jnp.mean((x - mean) ** 2, axis=(0, 2), keepdims=True)
        return (x - mean) / jnp.sqrt(var + eps) * g[None, :, None] + bt[None, :, None]

    def act(x):
        return jnp.where(x > 0, x, neg_slope * x)

    y = act(bn(conv1d(x_ncl, params["conv1_w"], params["conv1_b"]),
               params["bn_gamma"], params["bn_beta"]))
    z = act(bn(conv1d(y, params["conv2_w"], params["conv2_b"]),
               params["bn_gamma"], params["bn_beta"]))
    N, C2, L = z.shape
    return jnp.max(z.reshape(N, C2, L // 2, 2), axis=-1)


if __name__ == "__main__":
    key = jax.random.PRNGKey(0)
    kx, kp = jax.random.split(key)

    N, C, L = 2, 4, 16                       # input is (N, C, L) = NCL
    x = jax.random.normal(kx, (N, C, L), dtype=jnp.float32)
    params = init_params(kp, C)

    # Tight structural check: f32 MXU path vs full-f32 reference.
    out_f32 = jax.block_until_ready(contracting_block(x, params, mxu_dtype=jnp.float32))
    ref_f32 = _reference(x, params, conv_dtype=jnp.float32)
    assert out_f32.shape == (N, 2 * C, L // 2), out_f32.shape
    assert jnp.allclose(out_f32, ref_f32, atol=1e-4, rtol=1e-4), "f32 mismatch"

    # Fast path: bf16 MXU operands with f32 accumulation, checked against a
    # reference that also feeds the convs bf16 operands.
    out_bf16 = jax.block_until_ready(contracting_block(x, params))
    ref_bf16 = _reference(x, params, conv_dtype=jnp.bfloat16)
    assert jnp.allclose(out_bf16, ref_bf16, atol=5e-3, rtol=5e-3), "bf16 mismatch"

    print("KERNEL_OK")
</pallas_src>

<mosaic_0001>
module attributes {stable_mosaic.version = 11 : i64} {
  func.func @_conv_stats_kernel(%arg0: i32, %arg1: memref<1x16x4xf32, #tpu.memory_space<vmem>>, %arg2: memref<12x8xf32, #tpu.memory_space<vmem>>, %arg3: memref<1x16x8xf32, #tpu.memory_space<vmem>>, %arg4: memref<1x2x8xf32, #tpu.memory_space<vmem>>) attributes {dimension_semantics = [#tpu.dimension_semantics<parallel>], iteration_bounds = array<i64: 2>, scalar_prefetch = 0 : i64, scratch_operands = 0 : i64, tpu.core_type = #tpu.core_type<tc>, window_params = [{transform_indices = @transform_0, window_bounds = array<i64: 1, 16, 4>}, {pipeline_mode = #tpu.pipeline_mode<synchronous>, transform_indices = @transform_1, window_bounds = array<i64: 12, 8>}, {transform_indices = @transform_2, window_bounds = array<i64: 1, 16, 8>}, {transform_indices = @transform_3, window_bounds = array<i64: 1, 2, 8>}]} {
    %c0 = arith.constant 0 : index
    %c0_0 = arith.constant 0 : index
    %c0_1 = arith.constant 0 : index
    %0 = vector.load %arg1[%c0, %c0_0, %c0_1] : memref<1x16x4xf32, #tpu.memory_space<vmem>>, vector<1x16x4xf32>
    %1 = vector.shape_cast %0 : vector<1x16x4xf32> to vector<16x4xf32>
    %2 = tpu.iota {dimensions = array<i32: 0>} : vector<16x4xi32>
    %c0_i32 = arith.constant 0 : i32
    %3 = vector.broadcast %c0_i32 : i32 to vector<16x4xi32>
    %4 = arith.cmpi eq, %2, %3 : vector<16x4xi32>
    %c1_i32 = arith.constant 1 : i32
    %5 = tpu.dynamic_rotate %1 by %c1_i32 dim 0 : vector<16x4xf32>, i32 -> vector<16x4xf32>
    %cst = arith.constant 0.000000e+00 : f32
    %6 = vector.broadcast %cst : f32 to vector<16x4xf32>
    %7 = arith.select %4, %6, %5 : vector<16x4xi1>, vector<16x4xf32>
    %c15_i32 = arith.constant 15 : i32
    %8 = vector.broadcast %c15_i32 : i32 to vector<16x4xi32>
    %9 = arith.cmpi eq, %2, %8 : vector<16x4xi32>
    %c15_i32_2 = arith.constant 15 : i32
    %10 = tpu.dynamic_rotate %1 by %c15_i32_2 dim 0 : vector<16x4xf32>, i32 -> vector<16x4xf32>
    %cst_3 = arith.constant 0.000000e+00 : f32
    %11 = vector.broadcast %cst_3 : f32 to vector<16x4xf32>
    %12 = arith.select %9, %11, %10 : vector<16x4xi1>, vector<16x4xf32>
    %13 = tpu.concatenate %7, %1, %12 in 1 : vector<16x4xf32>, vector<16x4xf32>, vector<16x4xf32> -> vector<16x12xf32>
    %c0_4 = arith.constant 0 : index
    %c0_5 = arith.constant 0 : index
    %14 = vector.load %arg2[%c0_4, %c0_5] : memref<12x8xf32, #tpu.memory_space<vmem>>, vector<12x8xf32>
    %cst_6 = arith.constant dense<0.000000e+00> : vector<16x8xf32>
    %15 = tpu.matmul %13, %14, %cst_6 {dimension_numbers = #tpu.dot_dimension_numbers<[1], [0], [0], [1], [0, 0, 1, 1], [], []>} : vector<16x12xf32>, vector<12x8xf32>, vector<16x8xf32> -> vector<16x8xf32>
    %c0_7 = arith.constant 0 : index
    %c0_8 = arith.constant 0 : index
    %c0_9 = arith.constant 0 : index
    %16 = vector.load %arg3[%c0_7, %c0_8, %c0_9] : memref<1x16x8xf32, #tpu.memory_space<vmem>>, vector<1x16x8xf32>
    %17 = vector.shape_cast %16 : vector<1x16x8xf32> to vector<16x8xf32>
    %18 = vector.shape_cast %15 : vector<16x8xf32> to vector<1x16x8xf32>
    tpu.vector_store %arg3[%c0_7, %c0_8, %c0_9], %18 {strides = array<i32>} : memref<1x16x8xf32, #tpu.memory_space<vmem>>, vector<1x16x8xf32>,
    %cst_10 = arith.constant dense<0.000000e+00> : vector<8xf32>
    %19 = vector.multi_reduction <add>, %15, %cst_10 [0] : vector<16x8xf32> to vector<8xf32>
    %20 = vector.shape_cast %19 : vector<8xf32> to vector<1x8xf32>
    %21 = arith.mulf %15, %15 : vector<16x8xf32>
    %cst_11 = arith.constant dense<0.000000e+00> : vector<8xf32>
    %22 = vector.multi_reduction <add>, %21, %cst_11 [0] : vector<16x8xf32> to vector<8xf32>
    %23 = vector.shape_cast %22 : vector<8xf32> to vector<1x8xf32>
    %24 = tpu.concatenate %20, %23 in 0 : vector<1x8xf32>, vector<1x8xf32> -> vector<2x8xf32>
    %c0_12 = arith.constant 0 : index
    %c0_13 = arith.constant 0 : index
    %c0_14 = arith.constant 0 : index
    %25 = vector.load %arg4[%c0_12, %c0_13, %c0_14] : memref<1x2x8xf32, #tpu.memory_space<vmem>>, vector<1x2x8xf32>
    %26 = vector.shape_cast %25 : vector<1x2x8xf32> to vector<2x8xf32>
    %27 = vector.shape_cast %24 : vector<2x8xf32> to vector<1x2x8xf32>
    tpu.vector_store %arg4[%c0_12, %c0_13, %c0_14], %27 {strides = array<i32>} : memref<1x2x8xf32, #tpu.memory_space<vmem>>, vector<1x2x8xf32>,
    return
  }
  func.func @transform_0(%arg0: i32) -> (i32, i32, i32) {
    %c0_i32 = arith.constant 0 : i32
    %c0_i32_0 = arith.constant 0 : i32
    %c0_i32_1 = arith.constant 0 : i32
    return %arg0, %c0_i32, %c0_i32_0 : i32, i32, i32
  }
  func.func @transform_1(%arg0: i32) -> (i32, i32) {
    %c0_i32 = arith.constant 0 : i32
    %c0_i32_0 = arith.constant 0 : i32
    %c0_i32_1 = arith.constant 0 : i32
    return %c0_i32, %c0_i32_0 : i32, i32
  }
  func.func @transform_2(%arg0: i32) -> (i32, i32, i32) {
    %c0_i32 = arith.constant 0 : i32
    %c0_i32_0 = arith.constant 0 : i32
    %c0_i32_1 = arith.constant 0 : i32
    return %arg0, %c0_i32, %c0_i32_0 : i32, i32, i32
  }
  func.func @transform_3(%arg0: i32) -> (i32, i32, i32) {
    %c0_i32 = arith.constant 0 : i32
    %c0_i32_0 = arith.constant 0 : i32
    %c0_i32_1 = arith.constant 0 : i32
    return %arg0, %c0_i32, %c0_i32_0 : i32, i32, i32
  }
}

</mosaic_0001>

<bundles_post_ra>
// kernel: tpu_custom_call.1
= control target key start
LH: loop header
LB: loop body
LE: loop exit
PB: predicated region body
PF: predicated region fallthrough
CT: control target
= control target key end

     0   :  { %9 = vsyncpa [#allocation3], 0  ;;  %s719_s0 = inlined_call_operand.vmem [shape: f32[2,16,4], index: 0, kind: input, shape index: {}]   ;;  %s720_s1 = inlined_call_operand.vmem [shape: f32[12,8], index: 1, kind: input, shape index: {}]   ;;  %s721_s2 = inlined_call_operand.vmem [shape: f32[2,16,8], index: 2, kind: output, shape index: {0}]   ;;  %s722_s3 = inlined_call_operand.hbm [shape: f32[2,2,8], index: 3, kind: output, shape index: {1}]  }
   0x1   :  { %11 = vsyncpa [#allocation3 + $0x1], 0  ;;  %s602_s12 = smov 0   ;;  %s604_s13 = smov 0  }
   0x2   :  { %s606_s14 = smov 0   ;;  %s608_s15 = smov 0  }
   0x3 LB: > { %s623_s16 = sadd.s32 4294967295, %s577_s15   ;;  %s447_s17 = sadd.s32 4294967294, %s577_s15   ;;  %s577_s15 = sphi %s608_s15, %s728_s15   ;;  %s573_s14 = sphi %s606_s14, %s727_s14   ;;  %s569_s13 = sphi %s604_s13, %s726_s13   ;;  %s565_s12 = sphi %s602_s12, %s725_s12  }
   0x4   : > { %s627_s18 = sadd.s32 1, %s577_s15   ;;  %s97_s19 = sadd.s32 1, %s573_s14 }
   0x5   : > { %s94_s20 = ssub.s32 %s577_s15, %s627_s18  ;;  %p107_p0 = scmp.ne.s32.totalorder %s573_s14, %s569_s13 }
   0x6   : > { %p95_p1 = scmp.eq.s32.totalorder %s94_s20, 0  ;;  %p108_p2 = scmp.eq.s32.totalorder %s623_s16, 1 }
   0x7   : > { %p113_p3 = scmp.ne.s32.totalorder %s569_s13, %s565_s12  ;;  %p114_p4 = scmp.eq.s32.totalorder %s447_s17, 1 }
   0x8   : > { %s638_s21 = scalar_select %p95_p1, %s573_s14, %s97_s19  }
   0x9   : > { %p640_p5 = por %p108_p2, %p107_p0  ;;  %p644_p6 = por %p114_p4, %p113_p3 }
   0xa   : > { %p450_p7 = scmp.ge.s32.totalorder %s577_s15, 1  ;;  %p143_p8 = scmp.lt.s32.totalorder %s577_s15, 3 }
   0xc   : > { %p144_p9 = pnand %p450_p7, %p143_p8 }
   0xd   : > { %p172_p10 = scmp.lt.s32.totalorder (!%p144_p9), %s623_s16, 1  ;;  %s579_s6 = smov (!%p144_p9), 4  }
   0xe   : > { %147 = sbr.rel (%p144_p9) target bundleno = 373 (0x175), region = 28  ;;  %s580_s7 = smov (!%p144_p9), 8  }
   0xf   : > { %s169_s11 = sand.u32 (!%p144_p9), 1, %s569_s13   ;;  %s460_s19 = sshll.u32 (!%p144_p9), %s623_s16, 5 }
  0x10   : > { %s451_s17 = sshll.u32 (!%p144_p9), %s169_s11, 1  ;;  %s684_s27 = scalar_lea.hbm (!%p144_p9), %s722_s3, %s460_s19 }
  0x11   : > { %s171_s20 = scalar_lea.vmem (!%p144_p9), [#allocation2], %s451_s17 }
  0x12   : > { %s363_s24 = sshll.u32 (!%p144_p9), %s171_s20, 4  ;;  %s364_s24 = int_to_ptr.vmem [resolvable:$true] %s363_s24 }
  0x13   : > { %v184_v0 = vlaneseq  ;;  %v228_v1 = vld [vmem:[%s720_s1 + $0x8] sm:$0xf]  ;;  %vm236_vm0 = vcmask 1043456   ;;  %v227_v2 = vld [vmem:[%s720_s1] sm:$0xff]  ;;  %s658_s28 = scalar_select %p172_p10, %s623_s16, 1  ;;  %vm221_vm5 = vcmask 31744  }
  0x14   : > { %469 = vmatprep.subr.msk.mxu0 %vm236_vm0, %v228_v1  ;;  %vm224_vm6 = vcmask 64512   ;;  %vm229_vm7 = vcmask 97280   ;;  %vm337_vm8 = vcmask 1040384   ;;  %vm339_vm9 = vcmask 58368   ;;  %s581_s16 = smov [#allocation2]  }
  0x15   : > { %v185_v3 = vshrl.u32 %v184_v0, 7  ;;  %470 = vmatpush3.msk.msra.mxu0 %vm236_vm0, %v228_v1  ;;  %s463_s29 = sshll.u32 %s658_s28, 4  ;;  %s347_s28 = scalar_lea.sflag [#allocation3], %s169_s11 }
  0x16   : > { %471 = vmatprep.subr.mxu0 %v227_v2  ;;  %s176_s5 = scalar_lea.vmem %s719_s0, %s463_s29  ;;  %s181_s10 = scalar_lea.vmem %s721_s2, %s463_s29 }
  0x17   : > { %v186_v4 = vadd.s32 8, %v185_v3  ;;  %472 = vmatpush3.msra.mxu0 %v227_v2  ;;  %v182_v5 = vld [vmem:[%s176_s5] sm:$0xff]  ;;  %v183_v6 = vld [vmem:[%s176_s5 + $0x8] sm:$0xff]  ;;  %vm200_vm1 = vcmp.lt.s32.totalorder %v185_v3, 7  ;;  %vm187_vm2 = vcmp.eq.s32.totalorder %v185_v3, 0  ;;  %vm191_vm3 = vcmp.lt.s32.totalorder %v185_v3, 1 }
  0x18   : > { %v190_v7 = vrot.slane %v183_v6, 7  ;;  %207 = vrot.lane.b32.xlu0 %v182_v5, %s579_s6  ;;  %v189_v8 = vrot.slane %v182_v5, 7  ;;  %v198_v9 = vrot.slane %v182_v5, 1  ;;  %v199_v10 = vrot.slane %v183_v6, 1  ;;  %s517_s29 = scalar_lea.vmem %s364_s24, 32  ;;  %s521_s30 = sshll.u32 %s581_s16, 4  ;;  %s522_s30 = int_to_ptr.vmem [resolvable:$false] %s521_s30 }
  0x19   : > { %vm197_vm4 = vcmp.eq.s32.totalorder %v186_v4, 15  ;;  %p518_p11 = scmp.ne.s32.totalorder %s364_s24, %s517_s29  ;;  %s523_s4 = scalar_lea.vmem %s522_s30, 64 }
  0x1a   : > { %v201_v11 = vsel %vm200_vm1, %v198_v9, %v199_v10  ;;  %v202_v12 = vsel %vm200_vm1, %v199_v10, %v198_v9  ;;  %v193_v13 = vsel %vm191_vm3, %v190_v7, %v189_v8  ;;  %v192_v14 = vsel %vm191_vm3, %v189_v8, %v190_v7  ;;  %p524_p0 = scmp.lt.s32.totalorder %s364_s24, %s522_s30  ;;  %p525_p1 = scmp.lt.s32.totalorder %s523_s4, %s517_s29 }
  0x1b   : > { %215 = vrot.lane.b32.xlu1 %v201_v11, %s580_s7  ;;  %v194_v15 = vsel %vm187_vm2, 0.0, %v193_v13  ;;  %v204_v16 = vsel %vm197_vm4, 0.0, %v202_v12  ;;  %p519_p12 = pnand %p518_p11, %p640_p5 }
  0x1c   : > { %209 = vrot.lane.b32.xlu0 %v183_v6, %s579_s6  ;;  %p526_p2 = por %p525_p1, %p524_p0 }
  0x1d   : > { %p520_p13 = pneg %p519_p12 }
  0x1f   : > { %217 = vrot.lane.b32.xlu1 %v204_v16, %s580_s7  ;;  %p527_p3 = pnand %p526_p2, %p520_p13 }
  0x8a   : > { %v208_v17 = vpop.permute.xlu0 %207 }
  0x8b   : > { %v222_v18 = vsel %vm221_vm5, %v194_v15, %v208_v17 }
  0x8d   : > { %v216_v19 = vpop.permute.xlu1 %215 }
  0x8e   : > { %v225_v20 = vsel %vm224_vm6, %v222_v18, %v216_v19  ;;  %v210_v21 = vpop.permute.xlu0 %209 }
  0x8f   : > { %473 = vmatprep.mubr.msk.f32.mxu0 %vm229_vm7, %v225_v20  ;;  %v223_v22 = vsel %vm221_vm5, %v192_v14, %v210_v21 }
  0x91   : > { %v218_v23 = vpop.permute.xlu1 %217 }
  0x92   : > { %v226_v24 = vsel %vm224_vm6, %v223_v22, %v218_v23 }
  0x93   : > { %474 = vmatmul.mubr.msk.f32.vlgmr.msra.gmra.mxu0 %vm229_vm7, %v226_v24 }
 0x153   : > { %v475_v25 = vpop.f32.mrf.mxu0 }
 0x154   : > { %316 = vst.msk [vmem:[%s181_s10 + $0x8] sm:$0xff] %vm224_vm6, %v475_v25  ;;  %v327_v26 = vmul.f32 %v475_v25, %v475_v25  ;;  %v318_v28 = vsel %vm224_vm6, %v475_v25, 0.0 }
 0x155   : > { %v306_v27 = vpop.f32.mrf.mxu0 }
 0x156   : > { %315 = vst.msk [vmem:[%s181_s10] sm:$0xff] %vm224_vm6, %v306_v27  ;;  %v317_v29 = vsel %vm224_vm6, %v306_v27, 0.0  ;;  %v326_v30 = vmul.f32 %v306_v27, %v306_v27  ;;  %v329_v32 = vsel %vm224_vm6, %v327_v26, 0.0 }
 0x157   : > { %v319_v31 = vadd.f32 %v318_v28, %v317_v29 }
 0x158   : > { %v328_v33 = vsel %vm224_vm6, %v326_v30, 0.0 }
 0x159   : > { %v320_v34 = vrot.slane %v319_v31, 4  ;;  %v330_v35 = vadd.f32 %v329_v32, %v328_v33 }
 0x15b   : > { %v321_v36 = vadd.f32 %v320_v34, %v319_v31  ;;  %v331_v37 = vrot.slane %v330_v35, 4 }
 0x15d   : > { %v322_v38 = vrot.slane %v321_v36, 2  ;;  %v332_v39 = vadd.f32 %v331_v37, %v330_v35 }
 0x15f   : > { %v323_v40 = vadd.f32 %v322_v38, %v321_v36  ;;  %v333_v41 = vrot.slane %v332_v39, 2 }
 0x161   : > { %v324_v42 = vrot.slane %v323_v40, 1  ;;  %v334_v43 = vadd.f32 %v333_v41, %v332_v39 }
 0x163   : > { %v335_v44 = vrot.slane %v334_v43, 1  ;;  %v325_v45 = vadd.f32 %v324_v42, %v323_v40 }
 0x165   : > { %v336_v46 = vadd.f32 %v335_v44, %v334_v43 }
 0x167   : > { %v338_v47 = vsel %vm337_vm8, %v325_v45, %v336_v46 }
 0x168   : > { %340 = vst.msk [vmem:[%s171_s20] sm:$0x3] %vm339_vm9, %v338_v47 }
 0x169   : > { %530 = shalt.err (!%p527_p3)
}
 0x16a   : > { %s531_s5 = scalar_lea.hbm %s684_s27, 32  ;;  %s535_s8 = scalar_lea.hbm %s722_s3, 64 }
 0x16b   : > { %p532_p4 = scmp.ne.s32.totalorder %s684_s27, %s531_s5  ;;  %p536_p9 = scmp.lt.s32.totalorder %s684_s27, %s722_s3 }
 0x16c   : > { %p537_p10 = scmp.lt.s32.totalorder %s535_s8, %s531_s5 }
 0x16d   : > { %p533_p7 = pnand %p532_p4, %p640_p5 }
 0x16e   : > { %p538_p11 = por %p537_p10, %p536_p9 }
 0x16f   : > { %p534_p8 = pneg %p533_p7 }
 0x171   : > { %p539_p12 = pnand %p538_p11, %p534_p8 }
 0x173   : > { %542 = shalt.err (!%p539_p12)
}
 0x174   : > { %476 = dma.vmem_to_hbm [thread:$0]  (%p640_p5), %s364_s24, 32, %s684_s27, %s347_s28  }
 0x175 PF: > { %p482_p13 = scmp.ge.s32.totalorder %s577_s15, 2  ;;  %s383_s11 = sand.u32 1, %s565_s12  }
 0x176   : > { %s384_s17 = scalar_lea.sflag [#allocation3], %s383_s11 }
 0x177   : > { %p479_p0 = pnand %p482_p13, %p644_p6 }
 0x179   : > { %p480_p1 = pneg %p479_p0 }
 0x17b   : > { %560 = dma.done.wait (%p480_p1), %s384_s17, 32  }
 0x17c   : > { %562 = vsyncadd (%p480_p1), %s384_s17, 4294967264  ;;  %p14_p2 = scmp.ge.s32.totalorder %s627_s18, 4   ;;  %s725_s12 = smov %s569_s13 }
 0x17d   : > { %s726_s13 = smov %s573_s14  ;;  %s727_s14 = smov %s638_s21 }
 0x17e   : > { %s728_s15 = smov %s627_s18  ;;  %16 = sbr.rel (!%p14_p2) target bundleno = 3 (0x3), region = 75 }
 0x183   :  { %389 = vsyncpa [#allocation3], 1 }
 0x184   :  { %391 = vsyncpa [#allocation3 + $0x1], 1 }

</bundles_post_ra>
